<compile_context>
chip_gen: v7x
topology: tpu7x:2x2x1
jax: 0.10.0
libtpu: 0.0.40
codegen_flags: <defaults>
</compile_context>

<pallas_src>
import jax
import jax.numpy as jnp
from jax import lax
from jax.experimental import pallas as pl
from jax.experimental.pallas import tpu as pltpu


def _embedding_kernel(ids_ref, tok_tab_ref, pos_tab_ref, out_ref):
    # ids_ref:     (B*L,)   int32   SMEM  (scalar-prefetched token ids)
    # tok_tab_ref: (V, D)   float32 VMEM  (full token-embedding table)
    # pos_tab_ref: (L, D)   float32 VMEM  (full positional-embedding table)
    # out_ref:     (B*L, D) float32 VMEM
    n_rows = out_ref.shape[0]          # B * L   (static)
    L = pos_tab_ref.shape[0]           # sequence length (static)
    V = tok_tab_ref.shape[0]           # vocab size (static)
    B = n_rows // L                    # batch (static)

    # ---- Pass 1: token-row gather (scalar id read + lane-dense row copy) --
    def gather_row(n, carry):
        # Scalar read / clamp happen on the scalar unit (SMEM).
        # Clamp so an out-of-range id can never read OOB VMEM.
        # (PyTorch nn.Embedding raises on out-of-range ids instead.)
        tok_id = jnp.clip(ids_ref[n], 0, V - 1)
        out_ref[pl.ds(n, 1), :] = tok_tab_ref[pl.ds(tok_id, 1), :]
        return carry

    # Tiny trip count -> full unroll for LLO visibility; cap at real shapes.
    unroll = True if n_rows <= 64 else 8
    lax.fori_loop(0, n_rows, gather_row, None, unroll=unroll)

    # ---- Pass 2: positional add as B full-block VPU adds ------------------
    # Replaces B*L single-sublane loads/adds with ~ceil(L/8)*B full-vreg adds.
    pos = pos_tab_ref[...]                       # (L, D), loaded once
    for b in range(B):                           # static Python loop, B small
        sl = pl.ds(b * L, L)                     # static offset/size slice
        out_ref[sl, :] = out_ref[sl, :] + pos


def embedding_forward(x, embed_table, pos_table):
    """x: (B, L) int32 in [0, vocab_size). Returns (B, L, D) float32."""
    B, L = x.shape
    V, D = embed_table.shape
    assert pos_table.shape == (L, D)

    # Row-major flatten matches `l = b-row layout`; ids go to SMEM.
    ids = x.reshape(B * L).astype(jnp.int32)

    # Gather has no flops; one add per output element.
    flops = B * L * D
    bytes_accessed = (V * D + L * D + B * L * D) * 4 + B * L * 4

    out_flat = pl.pallas_call(
        _embedding_kernel,
        out_shape=jax.ShapeDtypeStruct((B * L, D), jnp.float32),
        grid_spec=pltpu.PrefetchScalarGridSpec(
            num_scalar_prefetch=1,             # ids -> SMEM, passed to index_maps
            grid=(1,),                         # single step: whole problem fits
            in_specs=[
                pl.BlockSpec((V, D), lambda i, ids_ref: (0, 0)),   # full embed table
                pl.BlockSpec((L, D), lambda i, ids_ref: (0, 0)),   # full pos table
            ],
            out_specs=pl.BlockSpec((B * L, D), lambda i, ids_ref: (0, 0)),
        ),
        compiler_params=pltpu.CompilerParams(
            dimension_semantics=("arbitrary",)),
        cost_estimate=pl.CostEstimate(
            flops=flops, transcendentals=0, bytes_accessed=bytes_accessed),
    )(ids, embed_table, pos_table)

    return out_flat.reshape(B, L, D)


if __name__ == "__main__":
    # Module constants: dmodel=128, vocab_size=129, L = qH*qW + 1 (qH=qW=4 -> 17)
    dmodel = 128
    vocab_size = 128 + 1
    qH = qW = 4
    L = qH * qW + 1
    B = 2

    key = jax.random.PRNGKey(0)
    k_tok, k_pos, k_x = jax.random.split(key, 3)

    # Deterministic "nn.Embedding" weight init (standard normal, PyTorch default)
    embed_table = jax.random.normal(k_tok, (vocab_size, dmodel), dtype=jnp.float32)
    pos_table = jax.random.normal(k_pos, (L, dmodel), dtype=jnp.float32)

    # Token ids in [0, vocab_size)
    x = jax.random.randint(k_x, (B, L), 0, vocab_size, dtype=jnp.int32)

    y = embedding_forward(x, embed_table, pos_table)
    y = jax.block_until_ready(y)

    # Reference check (plain JAX gather + broadcast add)
    y_ref = jnp.take(embed_table, x, axis=0) + pos_table[None, :, :]
    assert y.shape == (B, L, dmodel)
    assert jnp.allclose(y, y_ref, atol=1e-5, rtol=1e-5)

    print("KERNEL_OK")
</pallas_src>

<mosaic_0001>
module attributes {stable_mosaic.version = 11 : i64} {
  func.func @_embedding_kernel(%arg0: i32, %arg1: memref<34xi32, #tpu.memory_space<smem>>, %arg2: memref<129x128xf32, #tpu.memory_space<vmem>>, %arg3: memref<17x128xf32, #tpu.memory_space<vmem>>, %arg4: memref<34x128xf32, #tpu.memory_space<vmem>>) attributes {dimension_semantics = [#tpu.dimension_semantics<arbitrary>], iteration_bounds = array<i64: 1>, scalar_prefetch = 1 : i64, scratch_operands = 0 : i64, tpu.core_type = #tpu.core_type<tc>, window_params = [{pipeline_mode = #tpu.pipeline_mode<synchronous>, transform_indices = @transform_0, window_bounds = array<i64: 129, 128>}, {pipeline_mode = #tpu.pipeline_mode<synchronous>, transform_indices = @transform_1, window_bounds = array<i64: 17, 128>}, {pipeline_mode = #tpu.pipeline_mode<synchronous>, transform_indices = @transform_2, window_bounds = array<i64: 34, 128>}]} {
    %c0_i32 = arith.constant 0 : i32
    %0 = arith.index_cast %c0_i32 : i32 to index
    %1 = memref.load %arg1[%0] : memref<34xi32, #tpu.memory_space<smem>>
    %c0_i32_0 = arith.constant 0 : i32
    %c128_i32 = arith.constant 128 : i32
    %2 = arith.maxsi %c0_i32_0, %1 : i32
    %3 = arith.minsi %c128_i32, %2 : i32
    %4 = arith.index_cast %3 : i32 to index
    %c0 = arith.constant 0 : index
    %5 = vector.load %arg2[%4, %c0] : memref<129x128xf32, #tpu.memory_space<vmem>>, vector<1x128xf32>
    %6 = arith.index_cast %c0_i32 : i32 to index
    %c0_1 = arith.constant 0 : index
    %7 = vector.load %arg4[%6, %c0_1] : memref<34x128xf32, #tpu.memory_space<vmem>>, vector<1x128xf32>
    tpu.vector_store %arg4[%6, %c0_1], %5 {strides = array<i32>} : memref<34x128xf32, #tpu.memory_space<vmem>>, vector<1x128xf32>,
    %c1_i32 = arith.constant 1 : i32
    %8 = arith.index_cast %c1_i32 : i32 to index
    %9 = memref.load %arg1[%8] : memref<34xi32, #tpu.memory_space<smem>>
    %c0_i32_2 = arith.constant 0 : i32
    %c128_i32_3 = arith.constant 128 : i32
    %10 = arith.maxsi %c0_i32_2, %9 : i32
    %11 = arith.minsi %c128_i32_3, %10 : i32
    %12 = arith.index_cast %11 : i32 to index
    %c0_4 = arith.constant 0 : index
    %13 = vector.load %arg2[%12, %c0_4] : memref<129x128xf32, #tpu.memory_space<vmem>>, vector<1x128xf32>
    %14 = arith.index_cast %c1_i32 : i32 to index
    %c0_5 = arith.constant 0 : index
    %15 = vector.load %arg4[%14, %c0_5] : memref<34x128xf32, #tpu.memory_space<vmem>>, vector<1x128xf32>
    tpu.vector_store %arg4[%14, %c0_5], %13 {strides = array<i32>} : memref<34x128xf32, #tpu.memory_space<vmem>>, vector<1x128xf32>,
    %c2_i32 = arith.constant 2 : i32
    %16 = arith.index_cast %c2_i32 : i32 to index
    %17 = memref.load %arg1[%16] : memref<34xi32, #tpu.memory_space<smem>>
    %c0_i32_6 = arith.constant 0 : i32
    %c128_i32_7 = arith.constant 128 : i32
    %18 = arith.maxsi %c0_i32_6, %17 : i32
    %19 = arith.minsi %c128_i32_7, %18 : i32
    %20 = arith.index_cast %19 : i32 to index
    %c0_8 = arith.constant 0 : index
    %21 = vector.load %arg2[%20, %c0_8] : memref<129x128xf32, #tpu.memory_space<vmem>>, vector<1x128xf32>
    %22 = arith.index_cast %c2_i32 : i32 to index
    %c0_9 = arith.constant 0 : index
    %23 = vector.load %arg4[%22, %c0_9] : memref<34x128xf32, #tpu.memory_space<vmem>>, vector<1x128xf32>
    tpu.vector_store %arg4[%22, %c0_9], %21 {strides = array<i32>} : memref<34x128xf32, #tpu.memory_space<vmem>>, vector<1x128xf32>,
    %c3_i32 = arith.constant 3 : i32
    %24 = arith.index_cast %c3_i32 : i32 to index
    %25 = memref.load %arg1[%24] : memref<34xi32, #tpu.memory_space<smem>>
    %c0_i32_10 = arith.constant 0 : i32
    %c128_i32_11 = arith.constant 128 : i32
    %26 = arith.maxsi %c0_i32_10, %25 : i32
    %27 = arith.minsi %c128_i32_11, %26 : i32
    %28 = arith.index_cast %27 : i32 to index
    %c0_12 = arith.constant 0 : index
    %29 = vector.load %arg2[%28, %c0_12] : memref<129x128xf32, #tpu.memory_space<vmem>>, vector<1x128xf32>
    %30 = arith.index_cast %c3_i32 : i32 to index
    %c0_13 = arith.constant 0 : index
    %31 = vector.load %arg4[%30, %c0_13] : memref<34x128xf32, #tpu.memory_space<vmem>>, vector<1x128xf32>
    tpu.vector_store %arg4[%30, %c0_13], %29 {strides = array<i32>} : memref<34x128xf32, #tpu.memory_space<vmem>>, vector<1x128xf32>,
    %c4_i32 = arith.constant 4 : i32
    %32 = arith.index_cast %c4_i32 : i32 to index
    %33 = memref.load %arg1[%32] : memref<34xi32, #tpu.memory_space<smem>>
    %c0_i32_14 = arith.constant 0 : i32
    %c128_i32_15 = arith.constant 128 : i32
    %34 = arith.maxsi %c0_i32_14, %33 : i32
    %35 = arith.minsi %c128_i32_15, %34 : i32
    %36 = arith.index_cast %35 : i32 to index
    %c0_16 = arith.constant 0 : index
    %37 = vector.load %arg2[%36, %c0_16] : memref<129x128xf32, #tpu.memory_space<vmem>>, vector<1x128xf32>
    %38 = arith.index_cast %c4_i32 : i32 to index
    %c0_17 = arith.constant 0 : index
    %39 = vector.load %arg4[%38, %c0_17] : memref<34x128xf32, #tpu.memory_space<vmem>>, vector<1x128xf32>
    tpu.vector_store %arg4[%38, %c0_17], %37 {strides = array<i32>} : memref<34x128xf32, #tpu.memory_space<vmem>>, vector<1x128xf32>,
    %c5_i32 = arith.constant 5 : i32
    %40 = arith.index_cast %c5_i32 : i32 to index
    %41 = memref.load %arg1[%40] : memref<34xi32, #tpu.memory_space<smem>>
    %c0_i32_18 = arith.constant 0 : i32
    %c128_i32_19 = arith.constant 128 : i32
    %42 = arith.maxsi %c0_i32_18, %41 : i32
    %43 = arith.minsi %c128_i32_19, %42 : i32
    %44 = arith.index_cast %43 : i32 to index
    %c0_20 = arith.constant 0 : index
    %45 = vector.load %arg2[%44, %c0_20] : memref<129x128xf32, #tpu.memory_space<vmem>>, vector<1x128xf32>
    %46 = arith.index_cast %c5_i32 : i32 to index
    %c0_21 = arith.constant 0 : index
    %47 = vector.load %arg4[%46, %c0_21] : memref<34x128xf32, #tpu.memory_space<vmem>>, vector<1x128xf32>
    tpu.vector_store %arg4[%46, %c0_21], %45 {strides = array<i32>} : memref<34x128xf32, #tpu.memory_space<vmem>>, vector<1x128xf32>,
    %c6_i32 = arith.constant 6 : i32
    %48 = arith.index_cast %c6_i32 : i32 to index
    %49 = memref.load %arg1[%48] : memref<34xi32, #tpu.memory_space<smem>>
    %c0_i32_22 = arith.constant 0 : i32
    %c128_i32_23 = arith.constant 128 : i32
    %50 = arith.maxsi %c0_i32_22, %49 : i32
    %51 = arith.minsi %c128_i32_23, %50 : i32
    %52 = arith.index_cast %51 : i32 to index
    %c0_24 = arith.constant 0 : index
    %53 = vector.load %arg2[%52, %c0_24] : memref<129x128xf32, #tpu.memory_space<vmem>>, vector<1x128xf32>
    %54 = arith.index_cast %c6_i32 : i32 to index
    %c0_25 = arith.constant 0 : index
    %55 = vector.load %arg4[%54, %c0_25] : memref<34x128xf32, #tpu.memory_space<vmem>>, vector<1x128xf32>
    tpu.vector_store %arg4[%54, %c0_25], %53 {strides = array<i32>} : memref<34x128xf32, #tpu.memory_space<vmem>>, vector<1x128xf32>,
    %c7_i32 = arith.constant 7 : i32
    %56 = arith.index_cast %c7_i32 : i32 to index
    %57 = memref.load %arg1[%56] : memref<34xi32, #tpu.memory_space<smem>>
    %c0_i32_26 = arith.constant 0 : i32
    %c128_i32_27 = arith.constant 128 : i32
    %58 = arith.maxsi %c0_i32_26, %57 : i32
    %59 = arith.minsi %c128_i32_27, %58 : i32
    %60 = arith.index_cast %59 : i32 to index
    %c0_28 = arith.constant 0 : index
    %61 = vector.load %arg2[%60, %c0_28] : memref<129x128xf32, #tpu.memory_space<vmem>>, vector<1x128xf32>
    %62 = arith.index_cast %c7_i32 : i32 to index
    %c0_29 = arith.constant 0 : index
    %63 = vector.load %arg4[%62, %c0_29] : memref<34x128xf32, #tpu.memory_space<vmem>>, vector<1x128xf32>
    tpu.vector_store %arg4[%62, %c0_29], %61 {strides = array<i32>} : memref<34x128xf32, #tpu.memory_space<vmem>>, vector<1x128xf32>,
    %c8_i32 = arith.constant 8 : i32
    %64 = arith.index_cast %c8_i32 : i32 to index
    %65 = memref.load %arg1[%64] : memref<34xi32, #tpu.memory_space<smem>>
    %c0_i32_30 = arith.constant 0 : i32
    %c128_i32_31 = arith.constant 128 : i32
    %66 = arith.maxsi %c0_i32_30, %65 : i32
    %67 = arith.minsi %c128_i32_31, %66 : i32
    %68 = arith.index_cast %67 : i32 to index
    %c0_32 = arith.constant 0 : index
    %69 = vector.load %arg2[%68, %c0_32] : memref<129x128xf32, #tpu.memory_space<vmem>>, vector<1x128xf32>
    %70 = arith.index_cast %c8_i32 : i32 to index
    %c0_33 = arith.constant 0 : index
    %71 = vector.load %arg4[%70, %c0_33] : memref<34x128xf32, #tpu.memory_space<vmem>>, vector<1x128xf32>
    tpu.vector_store %arg4[%70, %c0_33], %69 {strides = array<i32>} : memref<34x128xf32, #tpu.memory_space<vmem>>, vector<1x128xf32>,
    %c9_i32 = arith.constant 9 : i32
    %72 = arith.index_cast %c9_i32 : i32 to index
    %73 = memref.load %arg1[%72] : memref<34xi32, #tpu.memory_space<smem>>
    %c0_i32_34 = arith.constant 0 : i32
    %c128_i32_35 = arith.constant 128 : i32
    %74 = arith.maxsi %c0_i32_34, %73 : i32
    %75 = arith.minsi %c128_i32_35, %74 : i32
    %76 = arith.index_cast %75 : i32 to index
    %c0_36 = arith.constant 0 : index
    %77 = vector.load %arg2[%76, %c0_36] : memref<129x128xf32, #tpu.memory_space<vmem>>, vector<1x128xf32>
    %78 = arith.index_cast %c9_i32 : i32 to index
    %c0_37 = arith.constant 0 : index
    %79 = vector.load %arg4[%78, %c0_37] : memref<34x128xf32, #tpu.memory_space<vmem>>, vector<1x128xf32>
    tpu.vector_store %arg4[%78, %c0_37], %77 {strides = array<i32>} : memref<34x128xf32, #tpu.memory_space<vmem>>, vector<1x128xf32>,
    %c10_i32 = arith.constant 10 : i32
    %80 = arith.index_cast %c10_i32 : i32 to index
    %81 = memref.load %arg1[%80] : memref<34xi32, #tpu.memory_space<smem>>
    %c0_i32_38 = arith.constant 0 : i32
    %c128_i32_39 = arith.constant 128 : i32
    %82 = arith.maxsi %c0_i32_38, %81 : i32
    %83 = arith.minsi %c128_i32_39, %82 : i32
    %84 = arith.index_cast %83 : i32 to index
    %c0_40 = arith.constant 0 : index
    %85 = vector.load %arg2[%84, %c0_40] : memref<129x128xf32, #tpu.memory_space<vmem>>, vector<1x128xf32>
    %86 = arith.index_cast %c10_i32 : i32 to index
    %c0_41 = arith.constant 0 : index
    %87 = vector.load %arg4[%86, %c0_41] : memref<34x128xf32, #tpu.memory_space<vmem>>, vector<1x128xf32>
    tpu.vector_store %arg4[%86, %c0_41], %85 {strides = array<i32>} : memref<34x128xf32, #tpu.memory_space<vmem>>, vector<1x128xf32>,
    %c11_i32 = arith.constant 11 : i32
    %88 = arith.index_cast %c11_i32 : i32 to index
    %89 = memref.load %arg1[%88] : memref<34xi32, #tpu.memory_space<smem>>
    %c0_i32_42 = arith.constant 0 : i32
    %c128_i32_43 = arith.constant 128 : i32
    %90 = arith.maxsi %c0_i32_42, %89 : i32
    %91 = arith.minsi %c128_i32_43, %90 : i32
    %92 = arith.index_cast %91 : i32 to index
    %c0_44 = arith.constant 0 : index
    %93 = vector.load %arg2[%92, %c0_44] : memref<129x128xf32, #tpu.memory_space<vmem>>, vector<1x128xf32>
    %94 = arith.index_cast %c11_i32 : i32 to index
    %c0_45 = arith.constant 0 : index
    %95 = vector.load %arg4[%94, %c0_45] : memref<34x128xf32, #tpu.memory_space<vmem>>, vector<1x128xf32>
    tpu.vector_store %arg4[%94, %c0_45], %93 {strides = array<i32>} : memref<34x128xf32, #tpu.memory_space<vmem>>, vector<1x128xf32>,
    %c12_i32 = arith.constant 12 : i32
    %96 = arith.index_cast %c12_i32 : i32 to index
    %97 = memref.load %arg1[%96] : memref<34xi32, #tpu.memory_space<smem>>
    %c0_i32_46 = arith.constant 0 : i32
    %c128_i32_47 = arith.constant 128 : i32
    %98 = arith.maxsi %c0_i32_46, %97 : i32
    %99 = arith.minsi %c128_i32_47, %98 : i32
    %100 = arith.index_cast %99 : i32 to index
    %c0_48 = arith.constant 0 : index
    %101 = vector.load %arg2[%100, %c0_48] : memref<129x128xf32, #tpu.memory_space<vmem>>, vector<1x128xf32>
    %102 = arith.index_cast %c12_i32 : i32 to index
    %c0_49 = arith.constant 0 : index
    %103 = vector.load %arg4[%102, %c0_49] : memref<34x128xf32, #tpu.memory_space<vmem>>, vector<1x128xf32>
    tpu.vector_store %arg4[%102, %c0_49], %101 {strides = array<i32>} : memref<34x128xf32, #tpu.memory_space<vmem>>, vector<1x128xf32>,
    %c13_i32 = arith.constant 13 : i32
    %104 = arith.index_cast %c13_i32 : i32 to index
    %105 = memref.load %arg1[%104] : memref<34xi32, #tpu.memory_space<smem>>
    %c0_i32_50 = arith.constant 0 : i32
    %c128_i32_51 = arith.constant 128 : i32
    %106 = arith.maxsi %c0_i32_50, %105 : i32
    %107 = arith.minsi %c128_i32_51, %106 : i32
    %108 = arith.index_cast %107 : i32 to index
    %c0_52 = arith.constant 0 : index
    %109 = vector.load %arg2[%108, %c0_52] : memref<129x128xf32, #tpu.memory_space<vmem>>, vector<1x128xf32>
    %110 = arith.index_cast %c13_i32 : i32 to index
    %c0_53 = arith.constant 0 : index
    %111 = vector.load %arg4[%110, %c0_53] : memref<34x128xf32, #tpu.memory_space<vmem>>, vector<1x128xf32>
    tpu.vector_store %arg4[%110, %c0_53], %109 {strides = array<i32>} : memref<34x128xf32, #tpu.memory_space<vmem>>, vector<1x128xf32>,
    %c14_i32 = arith.constant 14 : i32
    %112 = arith.index_cast %c14_i32 : i32 to index
    %113 = memref.load %arg1[%112] : memref<34xi32, #tpu.memory_space<smem>>
    %c0_i32_54 = arith.constant 0 : i32
    %c128_i32_55 = arith.constant 128 : i32
    %114 = arith.maxsi %c0_i32_54, %113 : i32
    %115 = arith.minsi %c128_i32_55, %114 : i32
    %116 = arith.index_cast %115 : i32 to index
    %c0_56 = arith.constant 0 : index
    %117 = vector.load %arg2[%116, %c0_56] : memref<129x128xf32, #tpu.memory_space<vmem>>, vector<1x128xf32>
    %118 = arith.index_cast %c14_i32 : i32 to index
    %c0_57 = arith.constant 0 : index
    %119 = vector.load %arg4[%118, %c0_57] : memref<34x128xf32, #tpu.memory_space<vmem>>, vector<1x128xf32>
    tpu.vector_store %arg4[%118, %c0_57], %117 {strides = array<i32>} : memref<34x128xf32, #tpu.memory_space<vmem>>, vector<1x128xf32>,
    %c15_i32 = arith.constant 15 : i32
    %120 = arith.index_cast %c15_i32 : i32 to index
    %121 = memref.load %arg1[%120] : memref<34xi32, #tpu.memory_space<smem>>
    %c0_i32_58 = arith.constant 0 : i32
    %c128_i32_59 = arith.constant 128 : i32
    %122 = arith.maxsi %c0_i32_58, %121 : i32
    %123 = arith.minsi %c128_i32_59, %122 : i32
    %124 = arith.index_cast %123 : i32 to index
    %c0_60 = arith.constant 0 : index
    %125 = vector.load %arg2[%124, %c0_60] : memref<129x128xf32, #tpu.memory_space<vmem>>, vector<1x128xf32>
    %126 = arith.index_cast %c15_i32 : i32 to index
    %c0_61 = arith.constant 0 : index
    %127 = vector.load %arg4[%126, %c0_61] : memref<34x128xf32, #tpu.memory_space<vmem>>, vector<1x128xf32>
    tpu.vector_store %arg4[%126, %c0_61], %125 {strides = array<i32>} : memref<34x128xf32, #tpu.memory_space<vmem>>, vector<1x128xf32>,
    %c16_i32 = arith.constant 16 : i32
    %128 = arith.index_cast %c16_i32 : i32 to index
    %129 = memref.load %arg1[%128] : memref<34xi32, #tpu.memory_space<smem>>
    %c0_i32_62 = arith.constant 0 : i32
    %c128_i32_63 = arith.constant 128 : i32
    %130 = arith.maxsi %c0_i32_62, %129 : i32
    %131 = arith.minsi %c128_i32_63, %130 : i32
    %132 = arith.index_cast %131 : i32 to index
    %c0_64 = arith.constant 0 : index
    %133 = vector.load %arg2[%132, %c0_64] : memref<129x128xf32, #tpu.memory_space<vmem>>, vector<1x128xf32>
    %134 = arith.index_cast %c16_i32 : i32 to index
    %c0_65 = arith.constant 0 : index
    %135 = vector.load %arg4[%134, %c0_65] : memref<34x128xf32, #tpu.memory_space<vmem>>, vector<1x128xf32>
    tpu.vector_store %arg4[%134, %c0_65], %133 {strides = array<i32>} : memref<34x128xf32, #tpu.memory_space<vmem>>, vector<1x128xf32>,
    %c17_i32 = arith.constant 17 : i32
    %136 = arith.index_cast %c17_i32 : i32 to index
    %137 = memref.load %arg1[%136] : memref<34xi32, #tpu.memory_space<smem>>
    %c0_i32_66 = arith.constant 0 : i32
    %c128_i32_67 = arith.constant 128 : i32
    %138 = arith.maxsi %c0_i32_66, %137 : i32
    %139 = arith.minsi %c128_i32_67, %138 : i32
    %140 = arith.index_cast %139 : i32 to index
    %c0_68 = arith.constant 0 : index
    %141 = vector.load %arg2[%140, %c0_68] : memref<129x128xf32, #tpu.memory_space<vmem>>, vector<1x128xf32>
    %142 = arith.index_cast %c17_i32 : i32 to index
    %c0_69 = arith.constant 0 : index
    %143 = vector.load %arg4[%142, %c0_69] : memref<34x128xf32, #tpu.memory_space<vmem>>, vector<1x128xf32>
    tpu.vector_store %arg4[%142, %c0_69], %141 {strides = array<i32>} : memref<34x128xf32, #tpu.memory_space<vmem>>, vector<1x128xf32>,
    %c18_i32 = arith.constant 18 : i32
    %144 = arith.index_cast %c18_i32 : i32 to index
    %145 = memref.load %arg1[%144] : memref<34xi32, #tpu.memory_space<smem>>
    %c0_i32_70 = arith.constant 0 : i32
    %c128_i32_71 = arith.constant 128 : i32
    %146 = arith.maxsi %c0_i32_70, %145 : i32
    %147 = arith.minsi %c128_i32_71, %146 : i32
    %148 = arith.index_cast %147 : i32 to index
    %c0_72 = arith.constant 0 : index
    %149 = vector.load %arg2[%148, %c0_72] : memref<129x128xf32, #tpu.memory_space<vmem>>, vector<1x128xf32>
    %150 = arith.index_cast %c18_i32 : i32 to index
    %c0_73 = arith.constant 0 : index
    %151 = vector.load %arg4[%150, %c0_73] : memref<34x128xf32, #tpu.memory_space<vmem>>, vector<1x128xf32>
    tpu.vector_store %arg4[%150, %c0_73], %149 {strides = array<i32>} : memref<34x128xf32, #tpu.memory_space<vmem>>, vector<1x128xf32>,
    %c19_i32 = arith.constant 19 : i32
    %152 = arith.index_cast %c19_i32 : i32 to index
    %153 = memref.load %arg1[%152] : memref<34xi32, #tpu.memory_space<smem>>
    %c0_i32_74 = arith.constant 0 : i32
    %c128_i32_75 = arith.constant 128 : i32
    %154 = arith.maxsi %c0_i32_74, %153 : i32
    %155 = arith.minsi %c128_i32_75, %154 : i32
    %156 = arith.index_cast %155 : i32 to index
    %c0_76 = arith.constant 0 : index
    %157 = vector.load %arg2[%156, %c0_76] : memref<129x128xf32, #tpu.memory_space<vmem>>, vector<1x128xf32>
    %158 = arith.index_cast %c19_i32 : i32 to index
    %c0_77 = arith.constant 0 : index
    %159 = vector.load %arg4[%158, %c0_77] : memref<34x128xf32, #tpu.memory_space<vmem>>, vector<1x128xf32>
    tpu.vector_store %arg4[%158, %c0_77], %157 {strides = array<i32>} : memref<34x128xf32, #tpu.memory_space<vmem>>, vector<1x128xf32>,
    %c20_i32 = arith.constant 20 : i32
    %160 = arith.index_cast %c20_i32 : i32 to index
    %161 = memref.load %arg1[%160] : memref<34xi32, #tpu.memory_space<smem>>
    %c0_i32_78 = arith.constant 0 : i32
    %c128_i32_79 = arith.constant 128 : i32
    %162 = arith.maxsi %c0_i32_78, %161 : i32
    %163 = arith.minsi %c128_i32_79, %162 : i32
    %164 = arith.index_cast %163 : i32 to index
    %c0_80 = arith.constant 0 : index
    %165 = vector.load %arg2[%164, %c0_80] : memref<129x128xf32, #tpu.memory_space<vmem>>, vector<1x128xf32>
    %166 = arith.index_cast %c20_i32 : i32 to index
    %c0_81 = arith.constant 0 : index
    %167 = vector.load %arg4[%166, %c0_81] : memref<34x128xf32, #tpu.memory_space<vmem>>, vector<1x128xf32>
    tpu.vector_store %arg4[%166, %c0_81], %165 {strides = array<i32>} : memref<34x128xf32, #tpu.memory_space<vmem>>, vector<1x128xf32>,
    %c21_i32 = arith.constant 21 : i32
    %168 = arith.index_cast %c21_i32 : i32 to index
    %169 = memref.load %arg1[%168] : memref<34xi32, #tpu.memory_space<smem>>
    %c0_i32_82 = arith.constant 0 : i32
    %c128_i32_83 = arith.constant 128 : i32
    %170 = arith.maxsi %c0_i32_82, %169 : i32
    %171 = arith.minsi %c128_i32_83, %170 : i32
    %172 = arith.index_cast %171 : i32 to index
    %c0_84 = arith.constant 0 : index
    %173 = vector.load %arg2[%172, %c0_84] : memref<129x128xf32, #tpu.memory_space<vmem>>, vector<1x128xf32>
    %174 = arith.index_cast %c21_i32 : i32 to index
    %c0_85 = arith.constant 0 : index
    %175 = vector.load %arg4[%174, %c0_85] : memref<34x128xf32, #tpu.memory_space<vmem>>, vector<1x128xf32>
    tpu.vector_store %arg4[%174, %c0_85], %173 {strides = array<i32>} : memref<34x128xf32, #tpu.memory_space<vmem>>, vector<1x128xf32>,
    %c22_i32 = arith.constant 22 : i32
    %176 = arith.index_cast %c22_i32 : i32 to index
    %177 = memref.load %arg1[%176] : memref<34xi32, #tpu.memory_space<smem>>
    %c0_i32_86 = arith.constant 0 : i32
    %c128_i32_87 = arith.constant 128 : i32
    %178 = arith.maxsi %c0_i32_86, %177 : i32
    %179 = arith.minsi %c128_i32_87, %178 : i32
    %180 = arith.index_cast %179 : i32 to index
    %c0_88 = arith.constant 0 : index
    %181 = vector.load %arg2[%180, %c0_88] : memref<129x128xf32, #tpu.memory_space<vmem>>, vector<1x128xf32>
    %182 = arith.index_cast %c22_i32 : i32 to index
    %c0_89 = arith.constant 0 : index
    %183 = vector.load %arg4[%182, %c0_89] : memref<34x128xf32, #tpu.memory_space<vmem>>, vector<1x128xf32>
    tpu.vector_store %arg4[%182, %c0_89], %181 {strides = array<i32>} : memref<34x128xf32, #tpu.memory_space<vmem>>, vector<1x128xf32>,
    %c23_i32 = arith.constant 23 : i32
    %184 = arith.index_cast %c23_i32 : i32 to index
    %185 = memref.load %arg1[%184] : memref<34xi32, #tpu.memory_space<smem>>
    %c0_i32_90 = arith.constant 0 : i32
    %c128_i32_91 = arith.constant 128 : i32
    %186 = arith.maxsi %c0_i32_90, %185 : i32
    %187 = arith.minsi %c128_i32_91, %186 : i32
    %188 = arith.index_cast %187 : i32 to index
    %c0_92 = arith.constant 0 : index
    %189 = vector.load %arg2[%188, %c0_92] : memref<129x128xf32, #tpu.memory_space<vmem>>, vector<1x128xf32>
    %190 = arith.index_cast %c23_i32 : i32 to index
    %c0_93 = arith.constant 0 : index
    %191 = vector.load %arg4[%190, %c0_93] : memref<34x128xf32, #tpu.memory_space<vmem>>, vector<1x128xf32>
    tpu.vector_store %arg4[%190, %c0_93], %189 {strides = array<i32>} : memref<34x128xf32, #tpu.memory_space<vmem>>, vector<1x128xf32>,
    %c24_i32 = arith.constant 24 : i32
    %192 = arith.index_cast %c24_i32 : i32 to index
    %193 = memref.load %arg1[%192] : memref<34xi32, #tpu.memory_space<smem>>
    %c0_i32_94 = arith.constant 0 : i32
    %c128_i32_95 = arith.constant 128 : i32
    %194 = arith.maxsi %c0_i32_94, %193 : i32
    %195 = arith.minsi %c128_i32_95, %194 : i32
    %196 = arith.index_cast %195 : i32 to index
    %c0_96 = arith.constant 0 : index
    %197 = vector.load %arg2[%196, %c0_96] : memref<129x128xf32, #tpu.memory_space<vmem>>, vector<1x128xf32>
    %198 = arith.index_cast %c24_i32 : i32 to index
    %c0_97 = arith.constant 0 : index
    %199 = vector.load %arg4[%198, %c0_97] : memref<34x128xf32, #tpu.memory_space<vmem>>, vector<1x128xf32>
    tpu.vector_store %arg4[%198, %c0_97], %197 {strides = array<i32>} : memref<34x128xf32, #tpu.memory_space<vmem>>, vector<1x128xf32>,
    %c25_i32 = arith.constant 25 : i32
    %200 = arith.index_cast %c25_i32 : i32 to index
    %201 = memref.load %arg1[%200] : memref<34xi32, #tpu.memory_space<smem>>
    %c0_i32_98 = arith.constant 0 : i32
    %c128_i32_99 = arith.constant 128 : i32
    %202 = arith.maxsi %c0_i32_98, %201 : i32
    %203 = arith.minsi %c128_i32_99, %202 : i32
    %204 = arith.index_cast %203 : i32 to index
    %c0_100 = arith.constant 0 : index
    %205 = vector.load %arg2[%204, %c0_100] : memref<129x128xf32, #tpu.memory_space<vmem>>, vector<1x128xf32>
    %206 = arith.index_cast %c25_i32 : i32 to index
    %c0_101 = arith.constant 0 : index
    %207 = vector.load %arg4[%206, %c0_101] : memref<34x128xf32, #tpu.memory_space<vmem>>, vector<1x128xf32>
    tpu.vector_store %arg4[%206, %c0_101], %205 {strides = array<i32>} : memref<34x128xf32, #tpu.memory_space<vmem>>, vector<1x128xf32>,
    %c26_i32 = arith.constant 26 : i32
    %208 = arith.index_cast %c26_i32 : i32 to index
    %209 = memref.load %arg1[%208] : memref<34xi32, #tpu.memory_space<smem>>
    %c0_i32_102 = arith.constant 0 : i32
    %c128_i32_103 = arith.constant 128 : i32
    %210 = arith.maxsi %c0_i32_102, %209 : i32
    %211 = arith.minsi %c128_i32_103, %210 : i32
    %212 = arith.index_cast %211 : i32 to index
    %c0_104 = arith.constant 0 : index
    %213 = vector.load %arg2[%212, %c0_104] : memref<129x128xf32, #tpu.memory_space<vmem>>, vector<1x128xf32>
    %214 = arith.index_cast %c26_i32 : i32 to index
    %c0_105 = arith.constant 0 : index
    %215 = vector.load %arg4[%214, %c0_105] : memref<34x128xf32, #tpu.memory_space<vmem>>, vector<1x128xf32>
    tpu.vector_store %arg4[%214, %c0_105], %213 {strides = array<i32>} : memref<34x128xf32, #tpu.memory_space<vmem>>, vector<1x128xf32>,
    %c27_i32 = arith.constant 27 : i32
    %216 = arith.index_cast %c27_i32 : i32 to index
    %217 = memref.load %arg1[%216] : memref<34xi32, #tpu.memory_space<smem>>
    %c0_i32_106 = arith.constant 0 : i32
    %c128_i32_107 = arith.constant 128 : i32
    %218 = arith.maxsi %c0_i32_106, %217 : i32
    %219 = arith.minsi %c128_i32_107, %218 : i32
    %220 = arith.index_cast %219 : i32 to index
    %c0_108 = arith.constant 0 : index
    %221 = vector.load %arg2[%220, %c0_108] : memref<129x128xf32, #tpu.memory_space<vmem>>, vector<1x128xf32>
    %222 = arith.index_cast %c27_i32 : i32 to index
    %c0_109 = arith.constant 0 : index
    %223 = vector.load %arg4[%222, %c0_109] : memref<34x128xf32, #tpu.memory_space<vmem>>, vector<1x128xf32>
    tpu.vector_store %arg4[%222, %c0_109], %221 {strides = array<i32>} : memref<34x128xf32, #tpu.memory_space<vmem>>, vector<1x128xf32>,
    %c28_i32 = arith.constant 28 : i32
    %224 = arith.index_cast %c28_i32 : i32 to index
    %225 = memref.load %arg1[%224] : memref<34xi32, #tpu.memory_space<smem>>
    %c0_i32_110 = arith.constant 0 : i32
    %c128_i32_111 = arith.constant 128 : i32
    %226 = arith.maxsi %c0_i32_110, %225 : i32
    %227 = arith.minsi %c128_i32_111, %226 : i32
    %228 = arith.index_cast %227 : i32 to index
    %c0_112 = arith.constant 0 : index
    %229 = vector.load %arg2[%228, %c0_112] : memref<129x128xf32, #tpu.memory_space<vmem>>, vector<1x128xf32>
    %230 = arith.index_cast %c28_i32 : i32 to index
    %c0_113 = arith.constant 0 : index
    %231 = vector.load %arg4[%230, %c0_113] : memref<34x128xf32, #tpu.memory_space<vmem>>, vector<1x128xf32>
    tpu.vector_store %arg4[%230, %c0_113], %229 {strides = array<i32>} : memref<34x128xf32, #tpu.memory_space<vmem>>, vector<1x128xf32>,
    %c29_i32 = arith.constant 29 : i32
    %232 = arith.index_cast %c29_i32 : i32 to index
    %233 = memref.load %arg1[%232] : memref<34xi32, #tpu.memory_space<smem>>
    %c0_i32_114 = arith.constant 0 : i32
    %c128_i32_115 = arith.constant 128 : i32
    %234 = arith.maxsi %c0_i32_114, %233 : i32
    %235 = arith.minsi %c128_i32_115, %234 : i32
    %236 = arith.index_cast %235 : i32 to index
    %c0_116 = arith.constant 0 : index
    %237 = vector.load %arg2[%236, %c0_116] : memref<129x128xf32, #tpu.memory_space<vmem>>, vector<1x128xf32>
    %238 = arith.index_cast %c29_i32 : i32 to index
    %c0_117 = arith.constant 0 : index
    %239 = vector.load %arg4[%238, %c0_117] : memref<34x128xf32, #tpu.memory_space<vmem>>, vector<1x128xf32>
    tpu.vector_store %arg4[%238, %c0_117], %237 {strides = array<i32>} : memref<34x128xf32, #tpu.memory_space<vmem>>, vector<1x128xf32>,
    %c30_i32 = arith.constant 30 : i32
    %240 = arith.index_cast %c30_i32 : i32 to index
    %241 = memref.load %arg1[%240] : memref<34xi32, #tpu.memory_space<smem>>
    %c0_i32_118 = arith.constant 0 : i32
    %c128_i32_119 = arith.constant 128 : i32
    %242 = arith.maxsi %c0_i32_118, %241 : i32
    %243 = arith.minsi %c128_i32_119, %242 : i32
    %244 = arith.index_cast %243 : i32 to index
    %c0_120 = arith.constant 0 : index
    %245 = vector.load %arg2[%244, %c0_120] : memref<129x128xf32, #tpu.memory_space<vmem>>, vector<1x128xf32>
    %246 = arith.index_cast %c30_i32 : i32 to index
    %c0_121 = arith.constant 0 : index
    %247 = vector.load %arg4[%246, %c0_121] : memref<34x128xf32, #tpu.memory_space<vmem>>, vector<1x128xf32>
    tpu.vector_store %arg4[%246, %c0_121], %245 {strides = array<i32>} : memref<34x128xf32, #tpu.memory_space<vmem>>, vector<1x128xf32>,
    %c31_i32 = arith.constant 31 : i32
    %248 = arith.index_cast %c31_i32 : i32 to index
    %249 = memref.load %arg1[%248] : memref<34xi32, #tpu.memory_space<smem>>
    %c0_i32_122 = arith.constant 0 : i32
    %c128_i32_123 = arith.constant 128 : i32
    %250 = arith.maxsi %c0_i32_122, %249 : i32
    %251 = arith.minsi %c128_i32_123, %250 : i32
    %252 = arith.index_cast %251 : i32 to index
    %c0_124 = arith.constant 0 : index
    %253 = vector.load %arg2[%252, %c0_124] : memref<129x128xf32, #tpu.memory_space<vmem>>, vector<1x128xf32>
    %254 = arith.index_cast %c31_i32 : i32 to index
    %c0_125 = arith.constant 0 : index
    %255 = vector.load %arg4[%254, %c0_125] : memref<34x128xf32, #tpu.memory_space<vmem>>, vector<1x128xf32>
    tpu.vector_store %arg4[%254, %c0_125], %253 {strides = array<i32>} : memref<34x128xf32, #tpu.memory_space<vmem>>, vector<1x128xf32>,
    %c32_i32 = arith.constant 32 : i32
    %256 = arith.index_cast %c32_i32 : i32 to index
    %257 = memref.load %arg1[%256] : memref<34xi32, #tpu.memory_space<smem>>
    %c0_i32_126 = arith.constant 0 : i32
    %c128_i32_127 = arith.constant 128 : i32
    %258 = arith.maxsi %c0_i32_126, %257 : i32
    %259 = arith.minsi %c128_i32_127, %258 : i32
    %260 = arith.index_cast %259 : i32 to index
    %c0_128 = arith.constant 0 : index
    %261 = vector.load %arg2[%260, %c0_128] : memref<129x128xf32, #tpu.memory_space<vmem>>, vector<1x128xf32>
    %262 = arith.index_cast %c32_i32 : i32 to index
    %c0_129 = arith.constant 0 : index
    %263 = vector.load %arg4[%262, %c0_129] : memref<34x128xf32, #tpu.memory_space<vmem>>, vector<1x128xf32>
    tpu.vector_store %arg4[%262, %c0_129], %261 {strides = array<i32>} : memref<34x128xf32, #tpu.memory_space<vmem>>, vector<1x128xf32>,
    %c33_i32 = arith.constant 33 : i32
    %264 = arith.index_cast %c33_i32 : i32 to index
    %265 = memref.load %arg1[%264] : memref<34xi32, #tpu.memory_space<smem>>
    %c0_i32_130 = arith.constant 0 : i32
    %c128_i32_131 = arith.constant 128 : i32
    %266 = arith.maxsi %c0_i32_130, %265 : i32
    %267 = arith.minsi %c128_i32_131, %266 : i32
    %268 = arith.index_cast %267 : i32 to index
    %c0_132 = arith.constant 0 : index
    %269 = vector.load %arg2[%268, %c0_132] : memref<129x128xf32, #tpu.memory_space<vmem>>, vector<1x128xf32>
    %270 = arith.index_cast %c33_i32 : i32 to index
    %c0_133 = arith.constant 0 : index
    %271 = vector.load %arg4[%270, %c0_133] : memref<34x128xf32, #tpu.memory_space<vmem>>, vector<1x128xf32>
    tpu.vector_store %arg4[%270, %c0_133], %269 {strides = array<i32>} : memref<34x128xf32, #tpu.memory_space<vmem>>, vector<1x128xf32>,
    %c34_i32 = arith.constant 34 : i32
    %c0_134 = arith.constant 0 : index
    %c0_135 = arith.constant 0 : index
    %272 = vector.load %arg3[%c0_134, %c0_135] : memref<17x128xf32, #tpu.memory_space<vmem>>, vector<17x128xf32>
    %c0_136 = arith.constant 0 : index
    %c0_137 = arith.constant 0 : index
    %273 = vector.load %arg4[%c0_136, %c0_137] : memref<34x128xf32, #tpu.memory_space<vmem>>, vector<17x128xf32>
    %274 = arith.addf %273, %272 : vector<17x128xf32>
    %c0_138 = arith.constant 0 : index
    %c0_139 = arith.constant 0 : index
    %275 = vector.load %arg4[%c0_138, %c0_139] : memref<34x128xf32, #tpu.memory_space<vmem>>, vector<17x128xf32>
    tpu.vector_store %arg4[%c0_138, %c0_139], %274 {strides = array<i32>} : memref<34x128xf32, #tpu.memory_space<vmem>>, vector<17x128xf32>,
    %c17 = arith.constant 17 : index
    %c0_140 = arith.constant 0 : index
    %276 = vector.load %arg4[%c17, %c0_140] : memref<34x128xf32, #tpu.memory_space<vmem>>, vector<17x128xf32>
    %277 = arith.addf %276, %272 : vector<17x128xf32>
    %c17_141 = arith.constant 17 : index
    %c0_142 = arith.constant 0 : index
    %278 = vector.load %arg4[%c17_141, %c0_142] : memref<34x128xf32, #tpu.memory_space<vmem>>, vector<17x128xf32>
    tpu.vector_store %arg4[%c17_141, %c0_142], %277 {strides = array<i32>} : memref<34x128xf32, #tpu.memory_space<vmem>>, vector<17x128xf32>,
    return
  }
  func.func @transform_0(%arg0: i32, %arg1: memref<34xi32, #tpu.memory_space<smem>>) -> (i32, i32) {
    %c0_i32 = arith.constant 0 : i32
    %c0_i32_0 = arith.constant 0 : i32
    %c0_i32_1 = arith.constant 0 : i32
    return %c0_i32, %c0_i32_0 : i32, i32
  }
  func.func @transform_1(%arg0: i32, %arg1: memref<34xi32, #tpu.memory_space<smem>>) -> (i32, i32) {
    %c0_i32 = arith.constant 0 : i32
    %c0_i32_0 = arith.constant 0 : i32
    %c0_i32_1 = arith.constant 0 : i32
    return %c0_i32, %c0_i32_0 : i32, i32
  }
  func.func @transform_2(%arg0: i32, %arg1: memref<34xi32, #tpu.memory_space<smem>>) -> (i32, i32) {
    %c0_i32 = arith.constant 0 : i32
    %c0_i32_0 = arith.constant 0 : i32
    %c0_i32_1 = arith.constant 0 : i32
    return %c0_i32, %c0_i32_0 : i32, i32
  }
}

</mosaic_0001>

<bundles_post_ra>
// kernel: tpu_custom_call.1
= control target key start
LH: loop header
LB: loop body
LE: loop exit
PB: predicated region body
PF: predicated region fallthrough
CT: control target
= control target key end

     0   :  { %s976_s0 = inlined_call_operand.hbm [shape: s32[34], index: 0, kind: input, shape index: {}]   ;;  %s977_s1 = inlined_call_operand.hbm [shape: f32[129,128], index: 1, kind: input, shape index: {}]   ;;  %s978_s2 = inlined_call_operand.hbm [shape: f32[17,128], index: 2, kind: input, shape index: {}]   ;;  %s979_s3 = inlined_call_operand.hbm [shape: f32[34,128], index: 3, kind: output, shape index: {}]  }
   0x1   :  { %s667_s14 = scalar_lea.hbm %s976_s0, 16 }
   0x2   :  { %p668_p0 = scmp.ne.s32.totalorder %s976_s0, %s667_s14  ;;  %p671_p1 = scmp.lt.u32.totalorder %s667_s14, %s976_s0 }
   0x4   :  { %p673_p2 = pnand %p671_p1, %p668_p0 }
   0x6   :  { %676 = shalt.err (!%p673_p2)  }
   0x7   :  { %s751_s19 = smov [#allocation3]  }
   0x8   :  { %9 = dma.hbm_to_smem %s976_s0, 16, %s751_s19, [#allocation2] }
   0x9   :  { %743 = dma.done.wait [#allocation2], 16 }
   0xa   :  { %744 = vsyncadd [#allocation2], 4294967280 }
   0xb   :  { %11 = sfence }
   0xc   :  { %12 = vsyncpa [#allocation5], 0 }
   0xd   :  { %13 = vsyncpa [#allocation8], 0 }
   0xe   :  { %14 = vsyncpa [#allocation6], 0  ;;  %s752_s22 = smov [#allocation4]   ;;  %s677_s26 = scalar_lea.hbm %s977_s1, 2176 }
   0xf   :  { %s20_s23 = sshll.u32 %s752_s22, 4  ;;  %p678_p3 = scmp.ne.s32.totalorder %s977_s1, %s677_s26  ;;  %s21_s23 = int_to_ptr.vmem [resolvable:$true] %s20_s23 }
  0x10   :  { %p681_p4 = scmp.lt.u32.totalorder %s677_s26, %s977_s1 }
  0x12   :  { %p683_p5 = pnand %p681_p4, %p678_p3 }
  0x14   :  { %686 = shalt.err (!%p683_p5)
}
  0x15   :  { %s687_s0 = scalar_lea.vmem %s21_s23, 2176  ;;  %p692_p7 = scmp.lt.s32.totalorder %s21_s23, %s21_s23 }
  0x16   :  { %p688_p6 = scmp.ne.s32.totalorder %s21_s23, %s687_s0  ;;  %p693_p8 = scmp.lt.s32.totalorder %s687_s0, %s687_s0 }
  0x18   :  { %p694_p9 = por %p693_p8, %p692_p7 }
  0x1a   :  { %p695_p10 = pnand %p694_p9, %p688_p6 }
  0x1c   :  { %698 = shalt.err (!%p695_p10)
}
  0x1d   :  { %s753_s4 = smov 128   ;;  %s754_s5 = smov 8  }
  0x1e   :  { %26 = dma.hbm_to_vmem [thread:$0]  %s977_s1, 2176, %s21_s23, [#allocation5], %s753_s4, %s753_s4, %s754_s5  }
  0x1f   :  { %s755_s8 = smov [#allocation7]   ;;  %s699_s12 = scalar_lea.hbm %s978_s2, 384 }
  0x20   :  { %s32_s9 = sshll.u32 %s755_s8, 4  ;;  %p700_p11 = scmp.ne.s32.totalorder %s978_s2, %s699_s12  ;;  %s33_s9 = int_to_ptr.vmem [resolvable:$true] %s32_s9 }
  0x21   :  { %p703_p12 = scmp.lt.u32.totalorder %s699_s12, %s978_s2 }
  0x23   :  { %p705_p13 = pnand %p703_p12, %p700_p11 }
  0x25   :  { %708 = shalt.err (!%p705_p13)
}
  0x26   :  { %s709_s17 = scalar_lea.vmem %s33_s9, 384  ;;  %p714_p1 = scmp.lt.s32.totalorder %s33_s9, %s33_s9 }
  0x27   :  { %p710_p0 = scmp.ne.s32.totalorder %s33_s9, %s709_s17  ;;  %p715_p2 = scmp.lt.s32.totalorder %s709_s17, %s709_s17 }
  0x29   :  { %p716_p3 = por %p715_p2, %p714_p1 }
  0x2b   :  { %p717_p4 = pnand %p716_p3, %p710_p0 }
  0x2d   :  { %720 = shalt.err (!%p717_p4)
}
  0x2e   :  { %38 = dma.hbm_to_vmem [thread:$0]  %s978_s2, 384, %s33_s9, [#allocation8], %s753_s4, %s753_s4, %s754_s5  }
  0x2f   :  { %745 = dma.done.wait [#allocation5], 2176  }
  0x30   :  { %746 = vsyncadd [#allocation5], 4294965120 }
  0x31   :  { %747 = dma.done.wait [#allocation8], 384  }
  0x32   :  { %748 = vsyncadd [#allocation8], 4294966912  ;;  %s45_s19 = sld [smem:[#allocation3]]  ;;  %s395_s20 = sld [smem:[#allocation3 + $0x1]]  ;;  %v866_v9 = vld [vmem:[#allocation7] sm:$0xff]  ;;  %v903_v20 = vld [vmem:[#allocation7 + $0x8] sm:$0xff] }
  0x33   :  { %s819_s21 = sld [smem:[#allocation3 + $0x2]]  ;;  %s821_s22 = sld [smem:[#allocation3 + $0x3]]  ;;  %v910_v24 = vld [vmem:[#allocation7 + $0x10] sm:$0x1] }
  0x34   :  { %s823_s23 = sld [smem:[#allocation3 + $0x4]]  ;;  %s825_s24 = sld [smem:[#allocation3 + $0x5]] }
  0x35   :  { %s827_s25 = sld [smem:[#allocation3 + $0x6]]  ;;  %s829_s26 = sld [smem:[#allocation3 + $0x7]] }
  0x36   :  { %s831_s2 = sld [smem:[#allocation3 + $0x8]]  ;;  %s833_s27 = sld [smem:[#allocation3 + $0x9]] }
  0x37   :  { %s835_s28 = sld [smem:[#allocation3 + $0xa]]  ;;  %s837_s29 = sld [smem:[#allocation3 + $0xb]] }
  0x38   :  { %p46_p5 = scmp.gt.s32.totalorder %s45_s19, 0  ;;  %p390_p6 = scmp.lt.s32.totalorder %s45_s19, 128 }
  0x39   :  { %p54_p7 = scmp.gt.s32.totalorder %s395_s20, 0  ;;  %p396_p8 = scmp.lt.s32.totalorder %s395_s20, 128 }
  0x3a   :  { %s981_s19 = smov (!%p46_p5, %s45_s19), 0  ;;  %p62_p9 = scmp.gt.s32.totalorder %s819_s21, 0 }
  0x3b   :  { %s983_s20 = smov (!%p54_p7, %s395_s20), 0  ;;  %s985_s19 = smov (!%p390_p6, %s981_s19), 128 }
  0x3c   :  { %s987_s20 = smov (!%p396_p8, %s983_s20), 128  ;;  %s50_s30 = scalar_lea.vmem [#allocation4], %s985_s19 }
  0x3d   :  { %v51_v0 = vld [vmem:[%s50_s30] sm:$0x1]  ;;  %p402_p10 = scmp.lt.s32.totalorder %s819_s21, 128  ;;  %s58_s0 = scalar_lea.vmem [#allocation4], %s987_s20 }
  0x3e   :  { %52 = vst [vmem:[#allocation9] sm:$0x1] %v51_v0  ;;  %v59_v1 = vld [vmem:[%s58_s0] sm:$0x1]  ;;  %s989_s21 = smov (!%p62_p9, %s819_s21), 0  ;;  %p70_p11 = scmp.gt.s32.totalorder %s821_s22, 0 }
  0x3f   :  { %60 = vst [vmem:[#allocation9 + $0x1] sm:$0x1] %v59_v1  ;;  %p408_p12 = scmp.lt.s32.totalorder %s821_s22, 128  ;;  %s991_s21 = smov (!%p402_p10, %s989_s21), 128 }
  0x40   :  { %s993_s22 = smov (!%p70_p11, %s821_s22), 0  ;;  %p78_p13 = scmp.gt.s32.totalorder %s823_s23, 0 }
  0x41   :  { %s66_s6 = scalar_lea.vmem [#allocation4], %s991_s21  ;;  %s995_s22 = smov (!%p408_p12, %s993_s22), 128 }
  0x42   :  { %v67_v2 = vld [vmem:[%s66_s6] sm:$0x1]  ;;  %s79_s7 = scalar_select %p78_p13, %s823_s23, 0 }
  0x43   :  { %68 = vst [vmem:[#allocation9 + $0x2] sm:$0x1] %v67_v2  ;;  %p414_p0 = scmp.lt.s32.totalorder %s823_s23, 128  ;;  %s74_s8 = scalar_lea.vmem [#allocation4], %s995_s22 }
  0x44   :  { %v75_v3 = vld [vmem:[%s74_s8] sm:$0x1]  ;;  %p86_p1 = scmp.gt.s32.totalorder %s825_s24, 0  ;;  %p420_p2 = scmp.lt.s32.totalorder %s825_s24, 128 }
  0x45   :  { %76 = vst [vmem:[#allocation9 + $0x3] sm:$0x1] %v75_v3  ;;  %s997_s7 = smov (!%p414_p0, %s79_s7), 128  ;;  %p94_p3 = scmp.gt.s32.totalorder %s827_s25, 0 }
  0x46   :  { %s999_s24 = smov (!%p86_p1, %s825_s24), 0  ;;  %s82_s9 = scalar_lea.vmem [#allocation4], %s997_s7 }
  0x47   :  { %v83_v4 = vld [vmem:[%s82_s9] sm:$0x1]  ;;  %s1001_s24 = smov (!%p420_p2, %s999_s24), 128  ;;  %p426_p4 = scmp.lt.s32.totalorder %s827_s25, 128 }
  0x48   :  { %84 = vst [vmem:[#allocation9 + $0x4] sm:$0x1] %v83_v4  ;;  %s95_s10 = scalar_select %p94_p3, %s827_s25, 0 }
  0x49   :  { %s90_s11 = scalar_lea.vmem [#allocation4], %s1001_s24  ;;  %p102_p5 = scmp.gt.s32.totalorder %s829_s26, 0 }
  0x4a   :  { %v91_v5 = vld [vmem:[%s90_s11] sm:$0x1]  ;;  %p432_p6 = scmp.lt.s32.totalorder %s829_s26, 128  ;;  %s1003_s10 = smov (!%p426_p4, %s95_s10), 128 }
  0x4b   :  { %92 = vst [vmem:[#allocation9 + $0x5] sm:$0x1] %v91_v5  ;;  %s1005_s26 = smov (!%p102_p5, %s829_s26), 0  ;;  %p110_p7 = scmp.gt.s32.totalorder %s831_s2, 0 }
  0x4c   :  { %s98_s12 = scalar_lea.vmem [#allocation4], %s1003_s10  ;;  %s1007_s26 = smov (!%p432_p6, %s1005_s26), 128 }
  0x4d   :  { %v99_v6 = vld [vmem:[%s98_s12] sm:$0x1]  ;;  %s111_s13 = scalar_select %p110_p7, %s831_s2, 0 }
  0x4e   :  { %100 = vst [vmem:[#allocation9 + $0x6] sm:$0x1] %v99_v6  ;;  %p438_p8 = scmp.lt.s32.totalorder %s831_s2, 128  ;;  %s106_s14 = scalar_lea.vmem [#allocation4], %s1007_s26 }
  0x4f   :  { %v107_v7 = vld [vmem:[%s106_s14] sm:$0x1]  ;;  %p118_p9 = scmp.gt.s32.totalorder %s833_s27, 0  ;;  %p444_p10 = scmp.lt.s32.totalorder %s833_s27, 128 }
  0x50   :  { %108 = vst [vmem:[#allocation9 + $0x7] sm:$0x1] %v107_v7  ;;  %s1009_s13 = smov (!%p438_p8, %s111_s13), 128  ;;  %p126_p11 = scmp.gt.s32.totalorder %s835_s28, 0 }
  0x51   :  { %s1011_s27 = smov (!%p118_p9, %s833_s27), 0  ;;  %s114_s15 = scalar_lea.vmem [#allocation4], %s1009_s13 }
  0x52   :  { %v115_v8 = vld [vmem:[%s114_s15] sm:$0x1]  ;;  %s1013_s27 = smov (!%p444_p10, %s1011_s27), 128  ;;  %p450_p12 = scmp.lt.s32.totalorder %s835_s28, 128 }
  0x53   :  { %116 = vst [vmem:[#allocation9 + $0x8] sm:$0x1] %v115_v8  ;;  %s127_s16 = scalar_select %p126_p11, %s835_s28, 0 }
  0x54   :  { %s122_s17 = scalar_lea.vmem [#allocation4], %s1013_s27  ;;  %p134_p13 = scmp.gt.s32.totalorder %s837_s29, 0 }
  0x55   :  { %v123_v10 = vld [vmem:[%s122_s17] sm:$0x1]  ;;  %p456_p0 = scmp.lt.s32.totalorder %s837_s29, 128  ;;  %s1015_s16 = smov (!%p450_p12, %s127_s16), 128 }
  0x56   :  { %124 = vst [vmem:[#allocation9 + $0x9] sm:$0x1] %v123_v10  ;;  %s1017_s29 = smov (!%p134_p13, %s837_s29), 0  ;;  %s461_s1 = sld [smem:[#allocation3 + $0xc]] }
  0x57   :  { %v320_v11 = vld [vmem:[#allocation9] sm:$0xff]  ;;  %s130_s18 = scalar_lea.vmem [#allocation4], %s1015_s16  ;;  %s1019_s29 = smov (!%p456_p0, %s1017_s29), 128 }
  0x58   :  { %v323_v12 = vadd.f32 %v320_v11, %v866_v9  ;;  %v131_v13 = vld [vmem:[%s130_s18] sm:$0x1]  ;;  %s467_s19 = sld [smem:[#allocation3 + $0xd]]  ;;  %s872_s20 = sld [smem:[#allocation3 + $0xe]] }
  0x59   :  { %132 = vst [vmem:[#allocation9 + $0xa] sm:$0x1] %v131_v13  ;;  %s874_s21 = sld [smem:[#allocation3 + $0xf]]  ;;  %s138_s22 = scalar_lea.vmem [#allocation4], %s1019_s29 }
  0x5a   :  { %326 = vst [vmem:[#allocation9] sm:$0xff] %v323_v12  ;;  %v139_v14 = vld [vmem:[%s138_s22] sm:$0x1]  ;;  %s876_s23 = sld [smem:[#allocation3 + $0x10]]  ;;  %s878_s24 = sld [smem:[#allocation3 + $0x11]] }
  0x5b   :  { %140 = vst [vmem:[#allocation9 + $0xb] sm:$0x1] %v139_v14  ;;  %s880_s25 = sld [smem:[#allocation3 + $0x12]]  ;;  %s882_s26 = sld [smem:[#allocation3 + $0x13]] }
  0x5c   :  { %p142_p1 = scmp.gt.s32.totalorder %s461_s1, 0  ;;  %p462_p2 = scmp.lt.s32.totalorder %s461_s1, 128 }
  0x5d   :  { %s884_s2 = sld [smem:[#allocation3 + $0x14]]  ;;  %s886_s27 = sld [smem:[#allocation3 + $0x15]] }
  0x5e   :  { %s1021_s1 = smov (!%p142_p1, %s461_s1), 0  ;;  %p150_p3 = scmp.gt.s32.totalorder %s467_s19, 0 }
  0x5f   :  { %p468_p4 = scmp.lt.s32.totalorder %s467_s19, 128  ;;  %s1023_s1 = smov (!%p462_p2, %s1021_s1), 128 }
  0x60   :  { %s1025_s19 = smov (!%p150_p3, %s467_s19), 0  ;;  %p158_p5 = scmp.gt.s32.totalorder %s872_s20, 0 }
  0x61   :  { %s146_s28 = scalar_lea.vmem [#allocation4], %s1023_s1  ;;  %s1027_s19 = smov (!%p468_p4, %s1025_s19), 128 }
  0x62   :  { %v147_v15 = vld [vmem:[%s146_s28] sm:$0x1]  ;;  %s159_s29 = scalar_select %p158_p5, %s872_s20, 0 }
  0x63   :  { %148 = vst [vmem:[#allocation9 + $0xc] sm:$0x1] %v147_v15  ;;  %p474_p6 = scmp.lt.s32.totalorder %s872_s20, 128  ;;  %s154_s30 = scalar_lea.vmem [#allocation4], %s1027_s19 }
  0x64   :  { %v155_v16 = vld [vmem:[%s154_s30] sm:$0x1]  ;;  %p166_p7 = scmp.gt.s32.totalorder %s874_s21, 0  ;;  %p480_p8 = scmp.lt.s32.totalorder %s874_s21, 128 }
  0x65   :  { %156 = vst [vmem:[#allocation9 + $0xd] sm:$0x1] %v155_v16  ;;  %s1029_s29 = smov (!%p474_p6, %s159_s29), 128  ;;  %p174_p9 = scmp.gt.s32.totalorder %s876_s23, 0 }
  0x66   :  { %s1031_s21 = smov (!%p166_p7, %s874_s21), 0  ;;  %s162_s0 = scalar_lea.vmem [#allocation4], %s1029_s29 }
  0x67   :  { %v163_v17 = vld [vmem:[%s162_s0] sm:$0x1]  ;;  %s1033_s21 = smov (!%p480_p8, %s1031_s21), 128  ;;  %p486_p10 = scmp.lt.s32.totalorder %s876_s23, 128 }
  0x68   :  { %164 = vst [vmem:[#allocation9 + $0xe] sm:$0x1] %v163_v17  ;;  %s175_s6 = scalar_select %p174_p9, %s876_s23, 0 }
  0x69   :  { %s170_s7 = scalar_lea.vmem [#allocation4], %s1033_s21  ;;  %p182_p11 = scmp.gt.s32.totalorder %s878_s24, 0 }
  0x6a   :  { %v171_v18 = vld [vmem:[%s170_s7] sm:$0x1]  ;;  %p492_p12 = scmp.lt.s32.totalorder %s878_s24, 128  ;;  %s1035_s6 = smov (!%p486_p10, %s175_s6), 128 }
  0x6b   :  { %172 = vst [vmem:[#allocation9 + $0xf] sm:$0x1] %v171_v18  ;;  %s1037_s24 = smov (!%p182_p11, %s878_s24), 0  ;;  %p190_p13 = scmp.gt.s32.totalorder %s880_s25, 0 }
  0x6c   :  { %s178_s8 = scalar_lea.vmem [#allocation4], %s1035_s6  ;;  %s1039_s24 = smov (!%p492_p12, %s1037_s24), 128 }
  0x6d   :  { %v179_v19 = vld [vmem:[%s178_s8] sm:$0x1]  ;;  %s191_s9 = scalar_select %p190_p13, %s880_s25, 0 }
  0x6e   :  { %180 = vst [vmem:[#allocation9 + $0x10] sm:$0x1] %v179_v19  ;;  %p498_p0 = scmp.lt.s32.totalorder %s880_s25, 128  ;;  %s186_s10 = scalar_lea.vmem [#allocation4], %s1039_s24 }
  0x6f   :  { %v187_v21 = vld [vmem:[%s186_s10] sm:$0x1]  ;;  %p198_p1 = scmp.gt.s32.totalorder %s882_s26, 0  ;;  %p504_p2 = scmp.lt.s32.totalorder %s882_s26, 128 }
  0x70   :  { %188 = vst [vmem:[#allocation9 + $0x11] sm:$0x1] %v187_v21  ;;  %s1041_s9 = smov (!%p498_p0, %s191_s9), 128  ;;  %p206_p3 = scmp.gt.s32.totalorder %s884_s2, 0 }
  0x71   :  { %s1043_s26 = smov (!%p198_p1, %s882_s26), 0  ;;  %s194_s11 = scalar_lea.vmem [#allocation4], %s1041_s9 }
  0x72   :  { %v321_v22 = vld [vmem:[#allocation9 + $0x8] sm:$0xff]  ;;  %v195_v25 = vld [vmem:[%s194_s11] sm:$0x1]  ;;  %s1045_s26 = smov (!%p504_p2, %s1043_s26), 128  ;;  %p510_p4 = scmp.lt.s32.totalorder %s884_s2, 128 }
  0x73   :  { %v324_v23 = vadd.f32 %v321_v22, %v903_v20  ;;  %196 = vst [vmem:[#allocation9 + $0x12] sm:$0x1] %v195_v25  ;;  %s207_s12 = scalar_select %p206_p3, %s884_s2, 0 }
  0x74   :  { %s202_s13 = scalar_lea.vmem [#allocation4], %s1045_s26  ;;  %p214_p5 = scmp.gt.s32.totalorder %s886_s27, 0 }
  0x75   :  { %327 = vst [vmem:[#allocation9 + $0x8] sm:$0xff] %v324_v23  ;;  %v322_v26 = vld [vmem:[#allocation9 + $0x10] sm:$0x1]  ;;  %v203_v28 = vld [vmem:[%s202_s13] sm:$0x1]  ;;  %p516_p6 = scmp.lt.s32.totalorder %s886_s27, 128 }
  0x76   :  { %v325_v27 = vadd.f32 %v322_v26, %v910_v24  ;;  %204 = vst [vmem:[#allocation9 + $0x13] sm:$0x1] %v203_v28  ;;  %s1047_s12 = smov (!%p510_p4, %s207_s12), 128  ;;  %s1049_s27 = smov (!%p214_p5, %s886_s27), 0 }
  0x77   :  { %s521_s14 = sld [smem:[#allocation3 + $0x16]]  ;;  %s210_s15 = scalar_lea.vmem [#allocation4], %s1047_s12 }
  0x78   :  { %328 = vst [vmem:[#allocation9 + $0x10] sm:$0x1] %v325_v27  ;;  %v211_v29 = vld [vmem:[%s210_s15] sm:$0x1]  ;;  %s1051_s27 = smov (!%p516_p6, %s1049_s27), 128  ;;  %s527_s16 = sld [smem:[#allocation3 + $0x17]] }
  0x79   :  { %212 = vst [vmem:[#allocation9 + $0x14] sm:$0x1] %v211_v29  ;;  %s918_s17 = sld [smem:[#allocation3 + $0x18]]  ;;  %s920_s1 = sld [smem:[#allocation3 + $0x19]] }
  0x7a   :  { %s218_s18 = scalar_lea.vmem [#allocation4], %s1051_s27  ;;  %s922_s19 = sld [smem:[#allocation3 + $0x1a]] }
  0x7b   :  { %v219_v30 = vld [vmem:[%s218_s18] sm:$0x1]  ;;  %s924_s20 = sld [smem:[#allocation3 + $0x1b]]  ;;  %s926_s21 = sld [smem:[#allocation3 + $0x1c]] }
  0x7c   :  { %220 = vst [vmem:[#allocation9 + $0x15] sm:$0x1] %v219_v30  ;;  %s928_s22 = sld [smem:[#allocation3 + $0x1d]]  ;;  %s930_s23 = sld [smem:[#allocation3 + $0x1e]] }
  0x7d   :  { %p222_p7 = scmp.gt.s32.totalorder %s521_s14, 0  ;;  %p522_p8 = scmp.lt.s32.totalorder %s521_s14, 128 }
  0x7e   :  { %s932_s24 = sld [smem:[#allocation3 + $0x1f]]  ;;  %p230_p9 = scmp.gt.s32.totalorder %s527_s16, 0 }
  0x7f   :  { %s1053_s14 = smov (!%p222_p7, %s521_s14), 0  ;;  %p528_p10 = scmp.lt.s32.totalorder %s527_s16, 128 }
  0x80   :  { %s1055_s14 = smov (!%p522_p8, %s1053_s14), 128  ;;  %s1057_s16 = smov (!%p230_p9, %s527_s16), 0 }
  0x81   :  { %p238_p11 = scmp.gt.s32.totalorder %s918_s17, 0  ;;  %s226_s25 = scalar_lea.vmem [#allocation4], %s1055_s14 }
  0x82   :  { %v227_v31 = vld [vmem:[%s226_s25] sm:$0x1]  ;;  %s1059_s16 = smov (!%p528_p10, %s1057_s16), 128  ;;  %p534_p12 = scmp.lt.s32.totalorder %s918_s17, 128 }
  0x83   :  { %228 = vst [vmem:[#allocation9 + $0x16] sm:$0x1] %v227_v31  ;;  %s239_s26 = scalar_select %p238_p11, %s918_s17, 0 }
  0x84   :  { %s234_s2 = scalar_lea.vmem [#allocation4], %s1059_s16  ;;  %p246_p13 = scmp.gt.s32.totalorder %s920_s1, 0 }
  0x85   :  { %v235_v32 = vld [vmem:[%s234_s2] sm:$0x1]  ;;  %p540_p0 = scmp.lt.s32.totalorder %s920_s1, 128  ;;  %s1061_s26 = smov (!%p534_p12, %s239_s26), 128 }
  0x86   :  { %236 = vst [vmem:[#allocation9 + $0x17] sm:$0x1] %v235_v32  ;;  %s1063_s1 = smov (!%p246_p13, %s920_s1), 0  ;;  %p254_p1 = scmp.gt.s32.totalorder %s922_s19, 0 }
  0x87   :  { %s242_s27 = scalar_lea.vmem [#allocation4], %s1061_s26  ;;  %s1065_s1 = smov (!%p540_p0, %s1063_s1), 128 }
  0x88   :  { %v243_v33 = vld [vmem:[%s242_s27] sm:$0x1]  ;;  %s255_s28 = scalar_select %p254_p1, %s922_s19, 0 }
  0x89   :  { %244 = vst [vmem:[#allocation9 + $0x18] sm:$0x1] %v243_v33  ;;  %p546_p2 = scmp.lt.s32.totalorder %s922_s19, 128  ;;  %s250_s29 = scalar_lea.vmem [#allocation4], %s1065_s1 }
  0x8a   :  { %v251_v34 = vld [vmem:[%s250_s29] sm:$0x1]  ;;  %p262_p3 = scmp.gt.s32.totalorder %s924_s20, 0  ;;  %p552_p4 = scmp.lt.s32.totalorder %s924_s20, 128 }
  0x8b   :  { %252 = vst [vmem:[#allocation9 + $0x19] sm:$0x1] %v251_v34  ;;  %s1067_s28 = smov (!%p546_p2, %s255_s28), 128  ;;  %p270_p5 = scmp.gt.s32.totalorder %s926_s21, 0 }
  0x8c   :  { %s1069_s20 = smov (!%p262_p3, %s924_s20), 0  ;;  %s258_s30 = scalar_lea.vmem [#allocation4], %s1067_s28 }
  0x8d   :  { %v259_v35 = vld [vmem:[%s258_s30] sm:$0x1]  ;;  %s1071_s20 = smov (!%p552_p4, %s1069_s20), 128  ;;  %p558_p6 = scmp.lt.s32.totalorder %s926_s21, 128 }
  0x8e   :  { %260 = vst [vmem:[#allocation9 + $0x1a] sm:$0x1] %v259_v35  ;;  %s271_s0 = scalar_select %p270_p5, %s926_s21, 0 }
  0x8f   :  { %s266_s6 = scalar_lea.vmem [#allocation4], %s1071_s20  ;;  %p278_p7 = scmp.gt.s32.totalorder %s928_s22, 0 }
  0x90   :  { %v329_v36 = vld [vmem:[#allocation9 + $0x11] sm:$0xff]  ;;  %v267_v38 = vld [vmem:[%s266_s6] sm:$0x1]  ;;  %p564_p8 = scmp.lt.s32.totalorder %s928_s22, 128  ;;  %s1073_s0 = smov (!%p558_p6, %s271_s0), 128 }
  0x91   :  { %v332_v37 = vadd.f32 %v329_v36, %v866_v9  ;;  %268 = vst [vmem:[#allocation9 + $0x1b] sm:$0x1] %v267_v38  ;;  %s1075_s22 = smov (!%p278_p7, %s928_s22), 0  ;;  %p286_p9 = scmp.gt.s32.totalorder %s930_s23, 0 }
  0x92   :  { %s274_s7 = scalar_lea.vmem [#allocation4], %s1073_s0  ;;  %s1077_s22 = smov (!%p564_p8, %s1075_s22), 128 }
  0x93   :  { %335 = vst [vmem:[#allocation9 + $0x11] sm:$0xff] %v332_v37  ;;  %v275_v39 = vld [vmem:[%s274_s7] sm:$0x1]  ;;  %s287_s8 = scalar_select %p286_p9, %s930_s23, 0 }
  0x94   :  { %276 = vst [vmem:[#allocation9 + $0x1c] sm:$0x1] %v275_v39  ;;  %p570_p10 = scmp.lt.s32.totalorder %s930_s23, 128  ;;  %s282_s9 = scalar_lea.vmem [#allocation4], %s1077_s22 }
  0x95   :  { %v283_v40 = vld [vmem:[%s282_s9] sm:$0x1]  ;;  %p294_p11 = scmp.gt.s32.totalorder %s932_s24, 0  ;;  %p576_p12 = scmp.lt.s32.totalorder %s932_s24, 128 }
  0x96   :  { %284 = vst [vmem:[#allocation9 + $0x1d] sm:$0x1] %v283_v40  ;;  %s1079_s8 = smov (!%p570_p10, %s287_s8), 128  ;;  %s581_s10 = sld [smem:[#allocation3 + $0x20]] }
  0x97   :  { %s1081_s24 = smov (!%p294_p11, %s932_s24), 0  ;;  %s290_s11 = scalar_lea.vmem [#allocation4], %s1079_s8 }
  0x98   :  { %v291_v41 = vld [vmem:[%s290_s11] sm:$0x1]  ;;  %s1083_s24 = smov (!%p576_p12, %s1081_s24), 128  ;;  %s587_s12 = sld [smem:[#allocation3 + $0x21]] }
  0x99   :  { %292 = vst [vmem:[#allocation9 + $0x1e] sm:$0x1] %v291_v41  ;;  %s298_s13 = scalar_lea.vmem [#allocation4], %s1083_s24  ;;  %s756_s16 = smov [#allocation9]  }
  0x9a   :  { %v299_v42 = vld [vmem:[%s298_s13] sm:$0x1]  ;;  %s343_s17 = sshll.u32 %s756_s16, 4  ;;  %s344_s17 = int_to_ptr.vmem [resolvable:$true] %s343_s17 }
  0x9b   :  { %300 = vst [vmem:[#allocation9 + $0x1f] sm:$0x1] %v299_v42  ;;  %s721_s1 = scalar_lea.vmem %s344_s17, 640  ;;  %p726_p4 = scmp.lt.s32.totalorder %s344_s17, %s344_s17 }
  0x9c   :  { %p302_p13 = scmp.gt.s32.totalorder %s581_s10, 0  ;;  %p582_p0 = scmp.lt.s32.totalorder %s581_s10, 128 }
  0x9d   :  { %p722_p3 = scmp.ne.s32.totalorder %s344_s17, %s721_s1  ;;  %p727_p5 = scmp.lt.s32.totalorder %s721_s1, %s721_s1 }
  0x9e   :  { %s1085_s10 = smov (!%p302_p13, %s581_s10), 0  ;;  %p310_p1 = scmp.gt.s32.totalorder %s587_s12, 0 }
  0x9f   :  { %p588_p2 = scmp.lt.s32.totalorder %s587_s12, 128  ;;  %s1087_s10 = smov (!%p582_p0, %s1085_s10), 128 }
  0xa0   :  { %s1089_s12 = smov (!%p310_p1, %s587_s12), 0  ;;  %s306_s14 = scalar_lea.vmem [#allocation4], %s1087_s10 }
  0xa1   :  { %v307_v43 = vld [vmem:[%s306_s14] sm:$0x1]  ;;  %s1091_s12 = smov (!%p588_p2, %s1089_s12), 128  ;;  %p728_p6 = por %p727_p5, %p726_p4 }
  0xa2   :  { %308 = vst [vmem:[#allocation9 + $0x20] sm:$0x1] %v307_v43  ;;  %s314_s15 = scalar_lea.vmem [#allocation4], %s1091_s12 }
  0xa3   :  { %v315_v44 = vld [vmem:[%s314_s15] sm:$0x1]  ;;  %p729_p7 = pnand %p728_p6, %p722_p3 }
  0xa4   :  { %316 = vst [vmem:[#allocation9 + $0x21] sm:$0x1] %v315_v44 }
  0xa9   :  { %v330_v45 = vld [vmem:[#allocation9 + $0x19] sm:$0xff] }
  0xaa   :  { %v333_v46 = vadd.f32 %v330_v45, %v903_v20 }
  0xab   :  { %v331_v47 = vld [vmem:[#allocation9 + $0x21] sm:$0x1] }
  0xac   :  { %336 = vst [vmem:[#allocation9 + $0x19] sm:$0xff] %v333_v46  ;;  %v334_v48 = vadd.f32 %v331_v47, %v910_v24 }
  0xae   :  { %337 = vst [vmem:[#allocation9 + $0x21] sm:$0x1] %v334_v48 }
  0xaf   :  { %732 = shalt.err (!%p729_p7)
}
  0xb0   :  { %s733_s20 = scalar_lea.hbm %s979_s3, 640 }
  0xb1   :  { %p734_p8 = scmp.ne.s32.totalorder %s979_s3, %s733_s20  ;;  %p737_p9 = scmp.lt.u32.totalorder %s733_s20, %s979_s3 }
  0xb3   :  { %p739_p10 = pnand %p737_p9, %p734_p8 }
  0xb5   :  { %742 = shalt.err (!%p739_p10)
}
  0xb6   :  { %349 = dma.vmem_to_hbm [thread:$0]  %s344_s17, 640, %s979_s3, [#allocation6], %s753_s4, %s753_s4, %s754_s5  }
  0xb7   :  { %749 = dma.done.wait [#allocation6], 640  }
  0xb8   :  { %750 = vsyncadd [#allocation6], 4294966656 }
  0xb9   :  { %353 = vsyncpa [#allocation5], 1 }
  0xba   :  { %354 = vsyncpa [#allocation8], 1 }
  0xbb   :  { %355 = vsyncpa [#allocation6], 1 }

</bundles_post_ra>
